<compile_context>
chip_gen: v7x
topology: tpu7x:2x2x1
jax: 0.10.0
libtpu: 0.0.40
codegen_flags: <defaults>
</compile_context>

<pallas_src>
import functools
import math

import jax
import jax.numpy as jnp
import numpy as np
from jax.experimental import pallas as pl
from jax.experimental.pallas import tpu as pltpu


def _round_up(x: int, m: int) -> int:
    return (x + m - 1) // m * m


# VMEM working-set budgets (bytes), sized so that (double-buffered) tiles plus
# the resident W^T stay under v7x's 64 MiB per-TC VMEM (v5e/v6e have 128 MiB).
_RESIDENT_BUDGET = 24 * 1024 * 1024   # 2 x (I, tn) W^T block
_PIPELINE_BUDGET = 24 * 1024 * 1024   # 2 x (tb, I) x-tiles + 2 x (tb, tn) out-tiles


def _probe_copy_kernel(x_ref, o_ref):
    o_ref[...] = x_ref[...]


@functools.lru_cache(maxsize=None)
def _single_buffer_supported() -> bool:
    """Probe once whether pipeline_mode=pl.Buffered(1) compiles on this build.

    Resident operands with a constant index_map do not need Pallas' default
    double buffer; Buffered(1) halves their VMEM footprint at zero cost.  Fall
    back silently to default double-buffering if the build rejects it.
    """
    try:
        fn = pl.pallas_call(
            _probe_copy_kernel,
            out_shape=jax.ShapeDtypeStruct((8, 128), jnp.float32),
            grid=(1,),
            in_specs=[pl.BlockSpec((8, 128), lambda i: (0, 0),
                                   pipeline_mode=pl.Buffered(1))],
            out_specs=pl.BlockSpec((8, 128), lambda i: (0, 0)),
        )
        jax.jit(fn).lower(jnp.zeros((8, 128), jnp.float32)).compile()
        return True
    except Exception:
        return False


def _resident_spec(block_shape, index_map, constant):
    """BlockSpec for a resident operand; single-buffered when truly constant."""
    if constant and _single_buffer_supported():
        return pl.BlockSpec(block_shape, index_map, pipeline_mode=pl.Buffered(1))
    return pl.BlockSpec(block_shape, index_map)


def _share_linear_kernel(x_ref, wt_ref, bias_ref, o_ref, *, cast_to_bf16):
    # x_ref:    (TB, I)   pipelined over the batch grid axis
    # wt_ref:   (I, TN)   resident W^T slab, already in the matmul dtype
    # bias_ref: (1, TN)   resident, f32
    # o_ref:    (TB, TN)  pipelined output tile
    x = x_ref[...]
    if cast_to_bf16:
        x = x.astype(jnp.bfloat16)          # cheap per-tile VPU cast, hidden under MXU
    y = jnp.dot(x, wt_ref[...], preferred_element_type=jnp.float32)
    o_ref[...] = (y + bias_ref[...]).astype(o_ref.dtype)


def precompute_weight_t(warp, latent_params, *, in_features, out_features,
                        o_pad=None, matmul_dtype=jnp.bfloat16):
    """One-time W^T build: (warp @ latent).view(O, I) -> transpose -> pad -> cast.

    Contract the latent axis FIRST (f32), so the transposed/padded tensor is
    latent_size x smaller and the bf16 cast happens exactly once.  Weights are
    static across forward calls -- hoist / jit-cache this and pass the result
    to `share_linear_full(..., weight_t=...)`.
    """
    if o_pad is None:
        o_pad = _round_up(max(out_features, 256), 256)
    w = jnp.dot(warp.astype(jnp.float32), latent_params.astype(jnp.float32))
    wt = w.reshape(out_features, in_features).T            # (I, O) == W^T
    if o_pad != out_features:
        wt = jnp.pad(wt, ((0, 0), (0, o_pad - out_features)))
    return wt.astype(matmul_dtype)


def _choose_tiles(b, in_features, o_pad, x_itemsize, w_itemsize, out_itemsize,
                  block_rows):
    # N tile: largest 256-multiple divisor of o_pad whose (worst-case double
    # buffered) W^T block fits the resident budget; 256 always divides o_pad.
    k = o_pad // 256
    tn = 256
    for d in range(1, k + 1):
        if k % d == 0 and 2 * in_features * (256 * d) * w_itemsize <= _RESIDENT_BUDGET:
            tn = 256 * d

    # M tile: 256-aligned block_rows for large batches; a single 16-aligned
    # tile (bf16 sublane pack) for small batches so the tail tile is never
    # mostly padding.  Shrink if double-buffered x/out tiles overflow.
    tb = block_rows if b >= block_rows else max(16, _round_up(b, 16))
    while (2 * tb * (in_features * x_itemsize + tn * out_itemsize)
           > _PIPELINE_BUDGET and tb > 64):
        tb = max(64, _round_up(tb // 2, 16))
    return tb, tn


def share_linear_full(x, warp, latent_params, bias=None, *, in_features,
                      out_features, block_rows=512, use_bf16_matmul=True,
                      weight_t=None):
    """Forward of ShareLinearFull.

    x: (..., in_features); warp: (in*out, latent); latent_params: (latent,);
    bias: (out,) or None.  block_rows=512 is safe for v7x's 64 MiB VMEM; on
    128 MiB parts (v5e/v6e) 1024 amortizes per-step overhead further.
    """
    matmul_dtype = jnp.bfloat16 if use_bf16_matmul else jnp.float32
    # Lane-dense output, 256-multiple N for the 2x256^2 MXU (v6e/v7x).
    o_pad = _round_up(max(out_features, 256), 256)

    if weight_t is None:
        weight_t = precompute_weight_t(
            warp, latent_params, in_features=in_features,
            out_features=out_features, o_pad=o_pad, matmul_dtype=matmul_dtype)
    if weight_t.shape != (in_features, o_pad):
        raise ValueError(f"weight_t has shape {weight_t.shape}, "
                         f"expected {(in_features, o_pad)}")

    if bias is None:
        bias_p = jnp.zeros((o_pad,), jnp.float32)
    else:
        bias_p = bias.astype(jnp.float32)
        if o_pad != out_features:
            bias_p = jnp.pad(bias_p, (0, o_pad - out_features))
    bias2d = bias_p.reshape(1, o_pad)

    batch_dims = x.shape[:-1]
    x2d = x.reshape(-1, in_features)
    b = x2d.shape[0]
    out_dtype = x.dtype

    block_rows = max(256, _round_up(block_rows, 256))
    tb, tn = _choose_tiles(b, in_features, o_pad,
                           x2d.dtype.itemsize, weight_t.dtype.itemsize,
                           jnp.dtype(out_dtype).itemsize, block_rows)
    nb = pl.cdiv(b, tb)
    no = o_pad // tn
    b_pad = nb * tb
    if b_pad != b:
        x2d = jnp.pad(x2d, ((0, b_pad - b), (0, 0)))

    # Explicit scoped-VMEM limit from the actual working set (worst case: all
    # operands double-buffered) + headroom; overrides the small default limits.
    vmem_bytes = (2 * in_features * tn * weight_t.dtype.itemsize
                  + 2 * tn * 4
                  + 2 * tb * in_features * x2d.dtype.itemsize
                  + 2 * tb * tn * jnp.dtype(out_dtype).itemsize)
    vmem_limit = min(int(vmem_bytes * 1.25) + (2 << 20), 64 * 1024 * 1024)

    cost = pl.CostEstimate(
        flops=2 * b_pad * in_features * o_pad,
        transcendentals=0,
        bytes_accessed=int(no * x2d.size * x2d.dtype.itemsize
                           + weight_t.size * weight_t.dtype.itemsize
                           + bias2d.size * 4
                           + b_pad * o_pad * jnp.dtype(out_dtype).itemsize),
    )

    # Grid order (N outer, batch inner): the W^T block is constant across the
    # inner batch loop (fetched once per N stripe; once total when no == 1).
    out = pl.pallas_call(
        functools.partial(_share_linear_kernel, cast_to_bf16=use_bf16_matmul),
        out_shape=jax.ShapeDtypeStruct((b_pad, o_pad), out_dtype),
        grid_spec=pltpu.PrefetchScalarGridSpec(
            num_scalar_prefetch=0,
            grid=(no, nb),
            in_specs=[
                pl.BlockSpec((tb, in_features), lambda j, i: (i, 0)),          # x tile
                _resident_spec((in_features, tn), lambda j, i: (0, j),
                               constant=(no == 1)),                            # W^T
                _resident_spec((1, tn), lambda j, i: (0, j),
                               constant=(no == 1)),                            # bias
            ],
            out_specs=pl.BlockSpec((tb, tn), lambda j, i: (i, j)),
        ),
        compiler_params=pltpu.CompilerParams(
            dimension_semantics=("parallel", "parallel"),  # megacore on v7x; no-op v5e/v6e
            vmem_limit_bytes=vmem_limit,
        ),
        cost_estimate=cost,
    )(x2d, weight_t, bias2d)

    out = out[:b, :out_features]
    return out.reshape(*batch_dims, out_features)


if __name__ == "__main__":
    in_features = 32
    out_features = 16
    latent_size = 3
    batch = 8

    key = jax.random.PRNGKey(0)
    k_warp, k_lat, k_bias, k_x = jax.random.split(key, 4)

    # Deterministic init mirroring reset_parameters():
    #   warp ~ N(0, 0.01), latent ~ N(0, 1/out_features), bias ~ U(-1/sqrt(fan_in), +)
    warp = 0.01 * jax.random.normal(
        k_warp, (in_features * out_features, latent_size), jnp.float32)
    latent_params = (1.0 / out_features) * jax.random.normal(
        k_lat, (latent_size,), jnp.float32)
    bound = 1.0 / math.sqrt(in_features)
    bias = jax.random.uniform(k_bias, (out_features,), jnp.float32,
                              minval=-bound, maxval=bound)
    x = jax.random.normal(k_x, (batch, in_features), jnp.float32)

    # Pure-JAX reference (exact module semantics, f32).
    w_ref = (warp @ latent_params).reshape(out_features, in_features)
    y_ref = x @ w_ref.T + bias

    # 1) Exact-precision path (f32 matmul) -> tight check of semantics.
    y_f32 = share_linear_full(
        x, warp, latent_params, bias,
        in_features=in_features, out_features=out_features,
        use_bf16_matmul=False,
    )
    y_f32 = jax.block_until_ready(y_f32)
    np.testing.assert_allclose(np.asarray(y_f32), np.asarray(y_ref),
                               rtol=1e-5, atol=1e-5)

    # 2) Performance path: hoisted, precomputed bf16 W^T (weights are static
    #    across calls), f32 accumulation -> loose check.
    wt_bf16 = precompute_weight_t(warp, latent_params,
                                  in_features=in_features,
                                  out_features=out_features)
    y_bf16 = share_linear_full(
        x, warp, latent_params, bias,
        in_features=in_features, out_features=out_features,
        use_bf16_matmul=True, weight_t=wt_bf16,
    )
    y_bf16 = jax.block_until_ready(y_bf16)
    np.testing.assert_allclose(np.asarray(y_bf16), np.asarray(y_ref),
                               rtol=2e-2, atol=1e-3)

    print("KERNEL_OK")
</pallas_src>

<mosaic_0001>
module attributes {stable_mosaic.version = 11 : i64} {
  func.func @_share_linear_kernel(%arg0: i32, %arg1: i32, %arg2: memref<16x32xf32, #tpu.memory_space<vmem>>, %arg3: memref<32x256xf32, #tpu.memory_space<vmem>>, %arg4: memref<1x256xf32, #tpu.memory_space<vmem>>, %arg5: memref<16x256xf32, #tpu.memory_space<vmem>>) attributes {dimension_semantics = [#tpu.dimension_semantics<parallel>, #tpu.dimension_semantics<parallel>], iteration_bounds = array<i64: 1, 1>, scalar_prefetch = 0 : i64, scratch_operands = 0 : i64, tpu.core_type = #tpu.core_type<tc>, window_params = [{transform_indices = @transform_0, window_bounds = array<i64: 16, 32>}, {transform_indices = @transform_1, window_bounds = array<i64: 32, 256>}, {transform_indices = @transform_2, window_bounds = array<i64: 1, 256>}, {transform_indices = @transform_3, window_bounds = array<i64: 16, 256>}]} {
    %c0 = arith.constant 0 : index
    %c0_0 = arith.constant 0 : index
    %0 = vector.load %arg2[%c0, %c0_0] : memref<16x32xf32, #tpu.memory_space<vmem>>, vector<16x32xf32>
    %c0_1 = arith.constant 0 : index
    %c0_2 = arith.constant 0 : index
    %1 = vector.load %arg3[%c0_1, %c0_2] : memref<32x256xf32, #tpu.memory_space<vmem>>, vector<32x256xf32>
    %cst = arith.constant dense<0.000000e+00> : vector<16x256xf32>
    %2 = tpu.matmul %0, %1, %cst {dimension_numbers = #tpu.dot_dimension_numbers<[1], [0], [0], [1], [0, 0, 1, 1], [], []>} : vector<16x32xf32>, vector<32x256xf32>, vector<16x256xf32> -> vector<16x256xf32>
    %c0_3 = arith.constant 0 : index
    %c0_4 = arith.constant 0 : index
    %3 = vector.load %arg4[%c0_3, %c0_4] : memref<1x256xf32, #tpu.memory_space<vmem>>, vector<1x256xf32>
    %4 = vector.broadcast %3 : vector<1x256xf32> to vector<16x256xf32>
    %5 = arith.addf %2, %4 : vector<16x256xf32>
    %c0_5 = arith.constant 0 : index
    %c0_6 = arith.constant 0 : index
    %6 = vector.load %arg5[%c0_5, %c0_6] : memref<16x256xf32, #tpu.memory_space<vmem>>, vector<16x256xf32>
    tpu.vector_store %arg5[%c0_5, %c0_6], %5 {strides = array<i32>} : memref<16x256xf32, #tpu.memory_space<vmem>>, vector<16x256xf32>,
    return
  }
  func.func @transform_0(%arg0: i32, %arg1: i32) -> (i32, i32) {
    %c0_i32 = arith.constant 0 : i32
    %c0_i32_0 = arith.constant 0 : i32
    return %arg1, %c0_i32 : i32, i32
  }
  func.func @transform_1(%arg0: i32, %arg1: i32) -> (i32, i32) {
    %c0_i32 = arith.constant 0 : i32
    %c0_i32_0 = arith.constant 0 : i32
    return %c0_i32, %arg0 : i32, i32
  }
  func.func @transform_2(%arg0: i32, %arg1: i32) -> (i32, i32) {
    %c0_i32 = arith.constant 0 : i32
    %c0_i32_0 = arith.constant 0 : i32
    return %c0_i32, %arg0 : i32, i32
  }
  func.func @transform_3(%arg0: i32, %arg1: i32) -> (i32, i32) {
    %c0_i32 = arith.constant 0 : i32
    return %arg1, %arg0 : i32, i32
  }
}

</mosaic_0001>

<bundles_post_ra>
// kernel: tpu_custom_call.1
= control target key start
LH: loop header
LB: loop body
LE: loop exit
PB: predicated region body
PF: predicated region fallthrough
CT: control target
= control target key end

     0   :  { %8 = vsyncpa [#allocation3], 0  ;;  %s338_s0 = inlined_call_operand.hbm [shape: f32[16,32], index: 0, kind: input, shape index: {}]   ;;  %s339_s1 = inlined_call_operand.hbm [shape: f32[32,256], index: 1, kind: input, shape index: {}]   ;;  %s340_s2 = inlined_call_operand.vmem [shape: f32[1,256], index: 2, kind: input, shape index: {}]   ;;  %s341_s3 = inlined_call_operand.hbm [shape: f32[16,256], index: 3, kind: output, shape index: {}]  }
   0x1   :  { %9 = vsyncpa [#allocation6], 0 }
   0x2   :  { %10 = vsyncpa [#allocation4], 0  ;;  %s265_s12 = smov [#allocation2]   ;;  %s193_s16 = scalar_lea.hbm %s338_s0, 256 }
   0x3   :  { %s16_s13 = sshll.u32 %s265_s12, 4  ;;  %p194_p0 = scmp.ne.s32.totalorder %s338_s0, %s193_s16  ;;  %s17_s13 = int_to_ptr.vmem [resolvable:$true] %s16_s13 }
   0x4   :  { %p197_p1 = scmp.lt.u32.totalorder %s193_s16, %s338_s0 }
   0x6   :  { %p199_p2 = pnand %p197_p1, %p194_p0 }
   0x8   :  { %202 = shalt.err (!%p199_p2)
}
   0x9   :  { %s203_s21 = scalar_lea.vmem %s17_s13, 256  ;;  %p208_p4 = scmp.lt.s32.totalorder %s17_s13, %s17_s13 }
   0xa   :  { %p204_p3 = scmp.ne.s32.totalorder %s17_s13, %s203_s21  ;;  %p209_p5 = scmp.lt.s32.totalorder %s203_s21, %s203_s21 }
   0xc   :  { %p210_p6 = por %p209_p5, %p208_p4 }
   0xe   :  { %p211_p7 = pnand %p210_p6, %p204_p3 }
  0x10   :  { %214 = shalt.err (!%p211_p7)
}
  0x11   :  { %s266_s22 = smov 128   ;;  %s267_s23 = smov 8  }
  0x12   :  { %22 = dma.hbm_to_vmem [thread:$0]  %s338_s0, 256, %s17_s13, [#allocation3], %s266_s22, %s266_s22, %s267_s23  }
  0x13   :  { %s268_s26 = smov [#allocation5]   ;;  %s215_s30 = scalar_lea.hbm %s339_s1, 1024 }
  0x14   :  { %s28_s27 = sshll.u32 %s268_s26, 4  ;;  %p216_p8 = scmp.ne.s32.totalorder %s339_s1, %s215_s30  ;;  %s29_s27 = int_to_ptr.vmem [resolvable:$true] %s28_s27 }
  0x15   :  { %p219_p9 = scmp.lt.u32.totalorder %s215_s30, %s339_s1 }
  0x17   :  { %p221_p10 = pnand %p219_p9, %p216_p8 }
  0x19   :  { %224 = shalt.err (!%p221_p10)
}
  0x1a   :  { %s225_s8 = scalar_lea.vmem %s29_s27, 1024  ;;  %p230_p12 = scmp.lt.s32.totalorder %s29_s27, %s29_s27 }
  0x1b   :  { %p226_p11 = scmp.ne.s32.totalorder %s29_s27, %s225_s8  ;;  %p231_p13 = scmp.lt.s32.totalorder %s225_s8, %s225_s8 }
  0x1d   :  { %p232_p0 = por %p231_p13, %p230_p12 }
  0x1f   :  { %p233_p1 = pnand %p232_p0, %p226_p11 }
  0x21   :  { %236 = shalt.err (!%p233_p1)
}
  0x22   :  { %s269_s0 = smov 256   ;;  %s270_s9 = smov 16  }
  0x23   :  { %34 = dma.hbm_to_vmem [thread:$0]  %s339_s1, 1024, %s29_s27, [#allocation6], %s269_s0, %s269_s0, %s270_s9  }
  0x24   :  { %259 = dma.done.wait [#allocation3], 256  }
  0x25   :  { %260 = vsyncadd [#allocation3], 4294967040 }
  0x26   :  { %261 = dma.done.wait [#allocation6], 1024  }
  0x27   :  { %262 = vsyncadd [#allocation6], 4294966272  ;;  %v271_v0 = vmov 0.0   ;;  %v46_v1 = vld [vmem:[#allocation5 + $0x8] sm:$0xff]  ;;  %v48_v2 = vld [vmem:[#allocation5 + $0x18] sm:$0xff]  ;;  %vm65_vm0 = vcmask 261120   ;;  %v55_v15 = vlaneseq }
  0x28   :  { %136 = vmatprep.mubr.f32.mxu0 %v271_v0  ;;  %142 = vmatprep.mubr.f32.mxu1 %v271_v0  ;;  %v45_v3 = vld [vmem:[#allocation5] sm:$0xff]  ;;  %v173_v4 = vpack.c.bf16 %v48_v2, %v46_v1  ;;  %v47_v5 = vld [vmem:[#allocation5 + $0x10] sm:$0xff]  ;;  %v50_v6 = vld [vmem:[#allocation5 + $0x28] sm:$0xff]  ;;  %s272_s13 = smov [#allocation7]  }
  0x29   :  { %v52_v7 = vld [vmem:[#allocation5 + $0x38] sm:$0xff]  ;;  %v175_v8 = vpack.c.bf16 %v47_v5, %v45_v3  ;;  %v49_v10 = vld [vmem:[#allocation5 + $0x20] sm:$0xff]  ;;  %v51_v11 = vld [vmem:[#allocation5 + $0x30] sm:$0xff]  ;;  %v56_v16 = vshrl.u32 %v55_v15, 7  ;;  %s158_s14 = sshll.u32 %s272_s13, 4  ;;  %s159_s14 = int_to_ptr.vmem [resolvable:$true] %s158_s14 }
  0x2a   :  { %v177_v9 = vpack.c.bf16 %v52_v7, %v50_v6  ;;  %174 = vmatprep.subr.bf16.mxu0 %v173_v4  ;;  %181 = vmatprep.subr.bf16.mxu1 %v173_v4  ;;  %v179_v12 = vpack.c.bf16 %v51_v11, %v49_v10  ;;  %v43_v13 = vld [vmem:[#allocation2] sm:$0xff]  ;;  %v44_v14 = vld [vmem:[#allocation2 + $0x8] sm:$0xff]  ;;  %s237_s15 = scalar_lea.vmem %s159_s14, 512  ;;  %p242_p3 = scmp.lt.s32.totalorder %s159_s14, %s159_s14 }
  0x2b   :  { %176 = vmatpush1.bf16.msra.mxu0 %v175_v8  ;;  %183 = vmatpush1.bf16.msra.mxu1 %v175_v8  ;;  %v57_v17 = vsub.s32 0, %v56_v16  ;;  %v53_v18 = vld [vmem:[%s340_s2] sm:$0x3]  ;;  %v61_v19 = vsub.s32 1, %v56_v16  ;;  %p238_p2 = scmp.ne.s32.totalorder %s159_s14, %s237_s15  ;;  %p243_p4 = scmp.lt.s32.totalorder %s237_s15, %s237_s15 }
  0x2c   :  { %178 = vmatprep.subr.bf16.mxu0 %v177_v9  ;;  %182 = vmatprep.subr.bf16.mxu1 %v177_v9 }
  0x2d   :  { %v58_v20 = vrot.slane %v53_v18, %v57_v17  ;;  %v62_v21 = vrot.slane %v53_v18, %v61_v19  ;;  %p244_p5 = por %p243_p4, %p242_p3 }
  0x2f   :  { %180 = vmatpush1.bf16.msra.mxu0 %v179_v12  ;;  %184 = vmatpush1.bf16.msra.mxu1 %v179_v12  ;;  %p245_p6 = pnand %p244_p5, %p238_p2 }
  0x32   :  { %171 = vmatmul.mubr.msk.f32.vlgmr.msra.gmra.mrb[0].mxu0 %vm65_vm0, %v43_v13  ;;  %172 = vmatmul.mubr.msk.f32.vlgmr.msra.gmra.mrb[0].mxu1 %vm65_vm0, %v44_v14 }
 0x105   :  { %v138_v22 = vpop.f32.mrb[0].mxu0  ;;  %v144_v23 = vpop.f32.mrb[0].mxu1 }
 0x106   :  { %v139_v24 = vadd.f32 %v138_v22, %v58_v20  ;;  %v145_v25 = vadd.f32 %v144_v23, %v58_v20  ;;  %v140_v26 = vpop.f32.mrb[1].mxu0  ;;  %v146_v27 = vpop.f32.mrb[1].mxu1 }
 0x107   :  { %v141_v28 = vadd.f32 %v140_v26, %v62_v21  ;;  %v147_v29 = vadd.f32 %v146_v27, %v62_v21 }
 0x108   :  { %149 = vst [vmem:[#allocation7] sm:$0xff] %v139_v24  ;;  %151 = vst [vmem:[#allocation7 + $0x10] sm:$0xff] %v145_v25 }
 0x109   :  { %150 = vst [vmem:[#allocation7 + $0x8] sm:$0xff] %v141_v28  ;;  %152 = vst [vmem:[#allocation7 + $0x18] sm:$0xff] %v147_v29 }
 0x10a   :  { %248 = shalt.err (!%p245_p6)
}
 0x10b   :  { %s249_s17 = scalar_lea.hbm %s341_s3, 512 }
 0x10c   :  { %p250_p7 = scmp.ne.s32.totalorder %s341_s3, %s249_s17  ;;  %p253_p8 = scmp.lt.u32.totalorder %s249_s17, %s341_s3 }
 0x10e   :  { %p255_p9 = pnand %p253_p8, %p250_p7 }
 0x110   :  { %258 = shalt.err (!%p255_p9)
}
 0x111   :  { %164 = dma.vmem_to_hbm [thread:$0]  %s159_s14, 512, %s341_s3, [#allocation4], %s269_s0, %s269_s0, %s270_s9  }
 0x112   :  { %263 = dma.done.wait [#allocation4], 512  }
 0x113   :  { %264 = vsyncadd [#allocation4], 4294966784 }
 0x114   :  { %168 = vsyncpa [#allocation3], 1 }
 0x115   :  { %169 = vsyncpa [#allocation6], 1 }
 0x116   :  { %170 = vsyncpa [#allocation4], 1 }

</bundles_post_ra>
